<compile_context>
chip_gen: v7x
topology: tpu7x:2x2x1
jax: 0.10.0
libtpu: 0.0.40
codegen_flags: <defaults>
</compile_context>

<pallas_src>
import functools

import jax
import jax.numpy as jnp
from jax.experimental import pallas as pl
from jax.experimental.pallas import tpu as pltpu


def get_quantized_range(bitwidth):
    quantized_max = (1 << (bitwidth - 1)) - 1
    quantized_min = -(1 << (bitwidth - 1))
    return quantized_min, quantized_max


def _round_up(a, b):
    return (a + b - 1) // b * b


def _chip_info():
    """Best-effort chip generation string and TensorCores-per-chip."""
    gen = ""
    try:  # prefer the structured query over device_kind string matching
        info = pltpu.get_tpu_info()
        gen = str(getattr(info, "chip_version", "") or "").lower()
    except Exception:  # pragma: no cover
        gen = ""
    if not gen:
        try:
            gen = jax.devices()[0].device_kind.lower()
        except Exception:  # pragma: no cover
            gen = ""
    is_v7 = ("v7" in gen) or ("tpu7" in gen)
    num_tc = 2 if is_v7 else 1
    return gen, is_v7, num_tc


# ---------------------------------------------------------------------------
# Kernels
# ---------------------------------------------------------------------------

def _qlinear_kernel_int8(x_ref, w_ref, b_ref, s_ref, o_ref, acc_ref, *,
                         output_zero_point, qmin, qmax):
    """int8 x int8 -> int32 MXU path (v5e / v6e).  Exact integer accumulation."""
    k = pl.program_id(2)

    partial = jax.lax.dot_general(
        x_ref[...], w_ref[...],                               # int8 [tN,tK] @ int8 [tK,tO]
        dimension_numbers=(((1,), (0,)), ((), ())),
        preferred_element_type=jnp.int32,
    )

    @pl.when(k == 0)
    def _():
        # Fold the exact int32 bias into the accumulator init: no (tN,tO) zero-fill
        # pass and no bias add at finalize.
        acc_ref[...] = partial + b_ref[...]

    @pl.when(k != 0)
    def _():
        acc_ref[...] += partial

    @pl.when(k == pl.num_programs(2) - 1)
    def _():
        y = acc_ref[...].astype(jnp.float32) * s_ref[...] + jnp.float32(output_zero_point)
        y = jnp.clip(jnp.round(y), jnp.float32(qmin), jnp.float32(qmax))
        o_ref[...] = y.astype(jnp.int8)


def _qlinear_kernel_bf16(x_ref, w_ref, b_ref, s_ref, o_ref, acc_ref, *,
                         output_zero_point, qmin, qmax):
    """bf16 operands -> f32 accumulation (v7x MXU has no integer mode).

    x and W are pre-cast to bf16 outside the kernel (wrapper / load time), so there
    is no per-step VPU cast here.  int8 values (-128..127) are exact in bf16 and
    products are exact in the f32 accumulator (until |acc| exceeds 2^24).
    """
    # TODO(synk): for in_features >> 1024 the f32 accumulator can differ from the
    # int32 reference by +/-1 LSB after requant on this path; split K if bit-exactness
    # is required.
    k = pl.program_id(2)

    partial = jax.lax.dot_general(
        x_ref[...], w_ref[...],                               # bf16 [tN,tK] @ bf16 [tK,tO]
        dimension_numbers=(((1,), (0,)), ((), ())),
        preferred_element_type=jnp.float32,
    )

    @pl.when(k == 0)
    def _():
        acc_ref[...] = partial + b_ref[...].astype(jnp.float32)

    @pl.when(k != 0)
    def _():
        acc_ref[...] += partial

    @pl.when(k == pl.num_programs(2) - 1)
    def _():
        y = acc_ref[...] * s_ref[...] + jnp.float32(output_zero_point)
        y = jnp.clip(jnp.round(y), jnp.float32(qmin), jnp.float32(qmax))
        o_ref[...] = y.astype(jnp.int8)


# ---------------------------------------------------------------------------
# Module wrapper: weight prep happens ONCE at construction (model-load) time.
# ---------------------------------------------------------------------------

class QuantizedLinearPallas:
    """Pallas-backed QuantizedLinear.  Prepares weights once; forward is __call__."""

    def __init__(self, weight, bias, input_zero_point, output_zero_point,
                 input_scale, weight_scale, output_scale,
                 feature_bitwidth=8, weight_bitwidth=8,
                 tile_n=None, tile_o=None, tile_k=None):
        assert weight.dtype == jnp.int8
        O, K = weight.shape
        if bias is None:
            bias = jnp.zeros((O,), jnp.int32)
        assert bias.dtype == jnp.int32
        del input_zero_point, weight_bitwidth  # zero point folded into bias at calibration

        gen, is_v7, num_tc = _chip_info()
        self.use_bf16 = is_v7                      # v7x has no integer MXU mode

        # Generation-aware tile defaults.
        if is_v7 or ("v6" in gen):
            dn, do, dk = 512, 1024, 2048           # big steps; ~10-15 MiB VMEM w/ dbl buffers
        else:
            dn, do, dk = 256, 512, 1024            # v5e / unknown: 16 MiB scoped VMEM default
        tile_n = tile_n or dn
        tile_o = tile_o or do
        tile_k = tile_k or dk

        tO = min(tile_o, _round_up(O, 128))
        tK = min(tile_k, _round_up(K, 128))
        # Keep both TensorCores busy on 2-TC chips even when N fits in a single row
        # tile: guarantee >= 2 blocks along the (parallel) O axis when O >= 256.
        if num_tc >= 2 and _round_up(O, 128) >= 256:
            tO = min(tO, _round_up(_round_up(O, 128) // 2, 128))

        self.O, self.K = O, K
        self.tile_n, self.tO, self.tK = tile_n, tO, tK
        self.Opad = _round_up(O, tO)
        self.Kpad = _round_up(K, tK)

        # One-time weight prep: pad, transpose to [Kpad, Opad], (v7x) cast to bf16.
        # TODO(synk): for small-N (decode-like) shapes on v7x it can be better to keep
        # the weight in int8 HBM (half the DMA bytes) and cast the tile in-kernel.
        w_dtype = jnp.bfloat16 if self.use_bf16 else jnp.int8
        wT = jnp.pad(weight, ((0, self.Opad - O), (0, self.Kpad - K))).T.astype(w_dtype)
        self.wT = jax.block_until_ready(wT)

        self.bias2d = jax.block_until_ready(
            jnp.pad(bias.astype(jnp.int32), (0, self.Opad - O)).reshape(1, self.Opad))
        # Fold input_scale / output_scale into the per-channel weight scale (fp32,
        # same op order as the reference -> bit-identical scale).
        scale = (weight_scale.astype(jnp.float32) * jnp.float32(input_scale)) / jnp.float32(output_scale)
        self.scale2d = jax.block_until_ready(
            jnp.pad(scale, (0, self.Opad - O)).reshape(1, self.Opad))

        self.output_zero_point = int(output_zero_point)
        self.qmin, self.qmax = get_quantized_range(feature_bitwidth)

    def __call__(self, x):
        assert x.dtype == jnp.int8 and x.ndim == 2
        N, K = x.shape
        assert K == self.K

        tN = min(self.tile_n, _round_up(N, 32))
        Npad = _round_up(N, tN)

        x_p = x.astype(jnp.bfloat16) if self.use_bf16 else x
        if Npad != N or self.Kpad != K:                 # skip pad on the aligned case
            x_p = jnp.pad(x_p, ((0, Npad - N), (0, self.Kpad - K)))

        kernel_fn = _qlinear_kernel_bf16 if self.use_bf16 else _qlinear_kernel_int8
        acc_dtype = jnp.float32 if self.use_bf16 else jnp.int32
        kernel = functools.partial(
            kernel_fn,
            output_zero_point=self.output_zero_point,
            qmin=self.qmin, qmax=self.qmax,
        )

        tO, tK = self.tO, self.tK
        grid = (Npad // tN, self.Opad // tO, self.Kpad // tK)

        bpe = 2 if self.use_bf16 else 1
        # Double-buffered x / W / out tiles + f32/i32 accumulator + bias/scale rows.
        vmem_bytes = (2 * tN * tK * bpe + 2 * tK * tO * bpe
                      + 2 * tN * tO + tN * tO * 4 + 4 * 2 * tO * 4)
        vmem_cap = (56 << 20) if self.use_bf16 else (100 << 20)   # v7x: 64 MiB VMEM/TC
        vmem_limit = int(min(vmem_cap, max(2 * vmem_bytes, 32 << 20)))

        cost = pl.CostEstimate(
            flops=2 * N * self.K * self.O,
            bytes_accessed=N * self.K * bpe + self.K * self.O * bpe + N * self.O + 8 * self.O,
            transcendentals=0)

        out = pl.pallas_call(
            kernel,
            out_shape=jax.ShapeDtypeStruct((Npad, self.Opad), jnp.int8),
            grid_spec=pltpu.PrefetchScalarGridSpec(
                num_scalar_prefetch=0,
                grid=grid,
                in_specs=[
                    pl.BlockSpec((tN, tK), lambda i, j, k: (i, k)),   # x tile
                    pl.BlockSpec((tK, tO), lambda i, j, k: (k, j)),   # weight.T tile
                    pl.BlockSpec((1, tO), lambda i, j, k: (0, j)),    # bias row
                    pl.BlockSpec((1, tO), lambda i, j, k: (0, j)),    # folded requant scale row
                ],
                out_specs=pl.BlockSpec((tN, tO), lambda i, j, k: (i, j)),
                scratch_shapes=[pltpu.VMEM((tN, tO), acc_dtype)],
            ),
            compiler_params=pltpu.CompilerParams(
                dimension_semantics=("parallel", "parallel", "arbitrary"),
                vmem_limit_bytes=vmem_limit),
            cost_estimate=cost,
        )(x_p, self.wT, self.bias2d, self.scale2d)

        if Npad != N or self.Opad != self.O:            # skip slice on the aligned case
            out = out[:N, :self.O]
        return out


def quantized_linear_pallas(x, weight, bias, weight_scale, *,
                            input_zero_point, output_zero_point,
                            input_scale, output_scale,
                            feature_bitwidth=8, weight_bitwidth=8,
                            tile_n=None, tile_o=None, tile_k=None):
    """One-shot functional wrapper (prefer QuantizedLinearPallas to amortize weight prep)."""
    mod = QuantizedLinearPallas(
        weight, bias, input_zero_point, output_zero_point,
        input_scale, weight_scale, output_scale,
        feature_bitwidth=feature_bitwidth, weight_bitwidth=weight_bitwidth,
        tile_n=tile_n, tile_o=tile_o, tile_k=tile_k)
    return mod(x)


# ---------------------------------------------------------------------------
# Reference + tests
# ---------------------------------------------------------------------------

def _reference(x, weight, bias, weight_scale, *, output_zero_point,
               input_scale, output_scale, feature_bitwidth):
    qmin, qmax = get_quantized_range(feature_bitwidth)
    out = x.astype(jnp.int32) @ weight.astype(jnp.int32).T + bias.astype(jnp.int32)
    out = out.astype(jnp.float32) * (input_scale * weight_scale / output_scale)[None, :]
    out = out + output_zero_point
    out = jnp.clip(jnp.round(out), qmin, qmax).astype(jnp.int8)
    return out


def _run_case(key, N, K, O, **tile_kwargs):
    k1, k2, k3, k4 = jax.random.split(key, 4)
    x = jax.random.randint(k1, (N, K), -128, 128, dtype=jnp.int32).astype(jnp.int8)
    weight = jax.random.randint(k2, (O, K), -128, 128, dtype=jnp.int32).astype(jnp.int8)
    bias = jax.random.randint(k3, (O,), -512, 512, dtype=jnp.int32)
    weight_scale = jax.random.uniform(k4, (O,), jnp.float32, 0.01, 0.05)

    input_zero_point = 0
    output_zero_point = 3
    input_scale = 0.02
    output_scale = 0.5

    mod = QuantizedLinearPallas(
        weight, bias, input_zero_point, output_zero_point,
        input_scale, weight_scale, output_scale,
        feature_bitwidth=8, weight_bitwidth=8, **tile_kwargs)
    out = jax.block_until_ready(mod(x))

    ref = _reference(
        x, weight, bias, weight_scale,
        output_zero_point=output_zero_point,
        input_scale=input_scale,
        output_scale=output_scale,
        feature_bitwidth=8,
    )
    assert out.dtype == jnp.int8
    assert out.shape == (N, O)
    diff = jnp.max(jnp.abs(out.astype(jnp.int32) - ref.astype(jnp.int32)))
    assert int(diff) <= 0, f"max diff {int(diff)} for case N={N} K={K} O={O}"


if __name__ == "__main__":
    key = jax.random.PRNGKey(0)
    k_a, k_b = jax.random.split(key)

    # Small shapes consistent with the module (batch=8, in_features=32, out_features=16).
    _run_case(k_a, N=8, K=32, O=16)

    # Multi-tile grid (incl. K-axis accumulation) with unaligned N/O/K padding.
    _run_case(k_b, N=40, K=200, O=200, tile_n=32, tile_o=128, tile_k=128)

    print("KERNEL_OK")
</pallas_src>

<mosaic_0001>
module attributes {stable_mosaic.version = 11 : i64} {
  func.func @_qlinear_kernel_int8(%arg0: i32, %arg1: i32, %arg2: i32, %arg3: memref<32x128xi8, #tpu.memory_space<vmem>>, %arg4: memref<128x128xi8, #tpu.memory_space<vmem>>, %arg5: memref<1x128xi32, #tpu.memory_space<vmem>>, %arg6: memref<1x128xf32, #tpu.memory_space<vmem>>, %arg7: memref<32x128xi8, #tpu.memory_space<vmem>>, %arg8: memref<32x128xi32, #tpu.memory_space<vmem>>) attributes {dimension_semantics = [#tpu.dimension_semantics<parallel>, #tpu.dimension_semantics<parallel>, #tpu.dimension_semantics<arbitrary>], iteration_bounds = array<i64: 1, 1, 1>, scalar_prefetch = 0 : i64, scratch_operands = 1 : i64, tpu.core_type = #tpu.core_type<tc>, window_params = [{transform_indices = @transform_0, window_bounds = array<i64: 32, 128>}, {transform_indices = @transform_1, window_bounds = array<i64: 128, 128>}, {transform_indices = @transform_2, window_bounds = array<i64: 1, 128>}, {transform_indices = @transform_3, window_bounds = array<i64: 1, 128>}, {transform_indices = @transform_4, window_bounds = array<i64: 32, 128>}]} {
    %c0 = arith.constant 0 : index
    %c0_0 = arith.constant 0 : index
    %0 = vector.load %arg3[%c0, %c0_0] : memref<32x128xi8, #tpu.memory_space<vmem>>, vector<32x128xi8>
    %c0_1 = arith.constant 0 : index
    %c0_2 = arith.constant 0 : index
    %1 = vector.load %arg4[%c0_1, %c0_2] : memref<128x128xi8, #tpu.memory_space<vmem>>, vector<128x128xi8>
    %cst = arith.constant dense<0> : vector<32x128xi32>
    %2 = tpu.matmul %0, %1, %cst {dimension_numbers = #tpu.dot_dimension_numbers<[1], [0], [0], [1], [0, 0, 1, 1], [], []>} : vector<32x128xi8>, vector<128x128xi8>, vector<32x128xi32> -> vector<32x128xi32>
    %c0_i32 = arith.constant 0 : i32
    %3 = arith.cmpi eq, %arg2, %c0_i32 : i32
    %4 = arith.extui %3 : i1 to i32
    %c0_i32_3 = arith.constant 0 : i32
    %5 = arith.cmpi ne, %4, %c0_i32_3 : i32
    scf.if %5 {
      %c0_8 = arith.constant 0 : index
      %c0_9 = arith.constant 0 : index
      %12 = vector.load %arg5[%c0_8, %c0_9] : memref<1x128xi32, #tpu.memory_space<vmem>>, vector<1x128xi32>
      %13 = vector.broadcast %12 : vector<1x128xi32> to vector<32x128xi32>
      %14 = arith.addi %2, %13 : vector<32x128xi32>
      %c0_10 = arith.constant 0 : index
      %c0_11 = arith.constant 0 : index
      %15 = vector.load %arg8[%c0_10, %c0_11] : memref<32x128xi32, #tpu.memory_space<vmem>>, vector<32x128xi32>
      tpu.vector_store %arg8[%c0_10, %c0_11], %14 {strides = array<i32>} : memref<32x128xi32, #tpu.memory_space<vmem>>, vector<32x128xi32>,
    } else {
    }
    %c0_i32_4 = arith.constant 0 : i32
    %6 = arith.cmpi ne, %arg2, %c0_i32_4 : i32
    %7 = arith.extui %6 : i1 to i32
    %c0_i32_5 = arith.constant 0 : i32
    %8 = arith.cmpi ne, %7, %c0_i32_5 : i32
    scf.if %8 {
      %c0_8 = arith.constant 0 : index
      %c0_9 = arith.constant 0 : index
      %12 = vector.load %arg8[%c0_8, %c0_9] : memref<32x128xi32, #tpu.memory_space<vmem>>, vector<32x128xi32>
      %13 = arith.addi %12, %2 : vector<32x128xi32>
      %c0_10 = arith.constant 0 : index
      %c0_11 = arith.constant 0 : index
      %14 = vector.load %arg8[%c0_10, %c0_11] : memref<32x128xi32, #tpu.memory_space<vmem>>, vector<32x128xi32>
      tpu.vector_store %arg8[%c0_10, %c0_11], %13 {strides = array<i32>} : memref<32x128xi32, #tpu.memory_space<vmem>>, vector<32x128xi32>,
    } else {
    }
    %c0_i32_6 = arith.constant 0 : i32
    %9 = arith.cmpi eq, %arg2, %c0_i32_6 : i32
    %10 = arith.extui %9 : i1 to i32
    %c0_i32_7 = arith.constant 0 : i32
    %11 = arith.cmpi ne, %10, %c0_i32_7 : i32
    scf.if %11 {
      %c0_8 = arith.constant 0 : index
      %c0_9 = arith.constant 0 : index
      %12 = vector.load %arg8[%c0_8, %c0_9] : memref<32x128xi32, #tpu.memory_space<vmem>>, vector<32x128xi32>
      %13 = arith.sitofp %12 : vector<32x128xi32> to vector<32x128xf32>
      %c0_10 = arith.constant 0 : index
      %c0_11 = arith.constant 0 : index
      %14 = vector.load %arg6[%c0_10, %c0_11] : memref<1x128xf32, #tpu.memory_space<vmem>>, vector<1x128xf32>
      %15 = vector.broadcast %14 : vector<1x128xf32> to vector<32x128xf32>
      %16 = arith.mulf %13, %15 : vector<32x128xf32>
      %cst_12 = arith.constant 3.000000e+00 : f32
      %17 = vector.broadcast %cst_12 : f32 to vector<32x128xf32>
      %18 = arith.addf %16, %17 : vector<32x128xf32>
      %19 = math.roundeven %18 : vector<32x128xf32>
      %cst_13 = arith.constant -1.280000e+02 : f32
      %cst_14 = arith.constant 1.270000e+02 : f32
      %20 = vector.broadcast %cst_13 : f32 to vector<32x128xf32>
      %21 = arith.maximumf %20, %19 : vector<32x128xf32>
      %22 = vector.broadcast %cst_14 : f32 to vector<32x128xf32>
      %23 = arith.minimumf %22, %21 : vector<32x128xf32>
      %24 = arith.fptosi %23 : vector<32x128xf32> to vector<32x128xi8>
      %c0_15 = arith.constant 0 : index
      %c0_16 = arith.constant 0 : index
      %25 = vector.load %arg7[%c0_15, %c0_16] : memref<32x128xi8, #tpu.memory_space<vmem>>, vector<32x128xi8>
      tpu.vector_store %arg7[%c0_15, %c0_16], %24 {strides = array<i32>} : memref<32x128xi8, #tpu.memory_space<vmem>>, vector<32x128xi8>,
    } else {
    }
    return
  }
  func.func @transform_0(%arg0: i32, %arg1: i32, %arg2: i32) -> (i32, i32) {
    %c0_i32 = arith.constant 0 : i32
    return %arg0, %arg2 : i32, i32
  }
  func.func @transform_1(%arg0: i32, %arg1: i32, %arg2: i32) -> (i32, i32) {
    %c0_i32 = arith.constant 0 : i32
    return %arg2, %arg1 : i32, i32
  }
  func.func @transform_2(%arg0: i32, %arg1: i32, %arg2: i32) -> (i32, i32) {
    %c0_i32 = arith.constant 0 : i32
    %c0_i32_0 = arith.constant 0 : i32
    return %c0_i32, %arg1 : i32, i32
  }
  func.func @transform_3(%arg0: i32, %arg1: i32, %arg2: i32) -> (i32, i32) {
    %c0_i32 = arith.constant 0 : i32
    %c0_i32_0 = arith.constant 0 : i32
    return %c0_i32, %arg1 : i32, i32
  }
  func.func @transform_4(%arg0: i32, %arg1: i32, %arg2: i32) -> (i32, i32) {
    %c0_i32 = arith.constant 0 : i32
    return %arg0, %arg1 : i32, i32
  }
}

</mosaic_0001>

<bundles_post_ra>
// kernel: tpu_custom_call.1
= control target key start
LH: loop header
LB: loop body
LE: loop exit
PB: predicated region body
PF: predicated region fallthrough
CT: control target
= control target key end

     0   :  { %9 = vsyncpa [#allocation4], 0  ;;  %s416_s0 = inlined_call_operand.hbm [shape: s8[32,128], index: 0, kind: input, shape index: {}]   ;;  %s417_s1 = inlined_call_operand.hbm [shape: s8[128,128], index: 1, kind: input, shape index: {}]   ;;  %s418_s2 = inlined_call_operand.vmem [shape: s32[1,128], index: 2, kind: input, shape index: {}]   ;;  %s419_s3 = inlined_call_operand.vmem [shape: f32[1,128], index: 3, kind: input, shape index: {}]   ;;  %s420_s4 = inlined_call_operand.hbm [shape: s8[32,128], index: 4, kind: output, shape index: {}]  }
   0x1   :  { %10 = vsyncpa [#allocation7], 0 }
   0x2   :  { %11 = vsyncpa [#allocation5], 0  ;;  %s337_s15 = smov [#allocation3]   ;;  %s338_s17 = smov [#allocation6]  }
   0x3   :  { %s18_s16 = sshll.u32 %s337_s15, 4  ;;  %s27_s18 = sshll.u32 %s338_s17, 4  ;;  %s19_s16 = int_to_ptr.vmem [resolvable:$true] %s18_s16  ;;  %s367_s18 = int_to_ptr.vmem [resolvable:$true] %s27_s18 }
   0x4   :  { %s265_s21 = scalar_lea.hbm %s416_s0, 128 }
   0x5   :  { %p266_p0 = scmp.ne.s32.totalorder %s416_s0, %s265_s21  ;;  %p269_p1 = scmp.lt.u32.totalorder %s265_s21, %s416_s0 }
   0x7   :  { %p271_p2 = pnand %p269_p1, %p266_p0 }
   0x9   :  { %274 = shalt.err (!%p271_p2)
}
   0xa   :  { %s275_s26 = scalar_lea.vmem %s19_s16, 128  ;;  %p280_p4 = scmp.lt.s32.totalorder %s19_s16, %s19_s16 }
   0xb   :  { %p276_p3 = scmp.ne.s32.totalorder %s19_s16, %s275_s26  ;;  %p281_p5 = scmp.lt.s32.totalorder %s275_s26, %s275_s26 }
   0xd   :  { %p282_p6 = por %p281_p5, %p280_p4 }
   0xf   :  { %p283_p7 = pnand %p282_p6, %p276_p3 }
  0x11   :  { %286 = shalt.err (!%p283_p7)
}
  0x12   :  { %21 = dma.hbm_to_vmem [thread:$0]  %s416_s0, 128, %s19_s16, [#allocation4]  }
  0x13   :  { %s287_s5 = scalar_lea.hbm %s417_s1, 512 }
  0x14   :  { %p288_p8 = scmp.ne.s32.totalorder %s417_s1, %s287_s5  ;;  %p291_p9 = scmp.lt.u32.totalorder %s287_s5, %s417_s1 }
  0x16   :  { %p293_p10 = pnand %p291_p9, %p288_p8 }
  0x18   :  { %296 = shalt.err (!%p293_p10)
}
  0x19   :  { %s297_s10 = scalar_lea.vmem %s367_s18, 512  ;;  %p302_p12 = scmp.lt.s32.totalorder %s367_s18, %s367_s18 }
  0x1a   :  { %p298_p11 = scmp.ne.s32.totalorder %s367_s18, %s297_s10  ;;  %p303_p13 = scmp.lt.s32.totalorder %s297_s10, %s297_s10 }
  0x1c   :  { %p304_p0 = por %p303_p13, %p302_p12 }
  0x1e   :  { %p305_p1 = pnand %p304_p0, %p298_p11 }
  0x20   :  { %308 = shalt.err (!%p305_p1)
}
  0x21   :  { %s339_s0 = smov 128   ;;  %s340_s11 = smov 8  }
  0x22   :  { %33 = dma.hbm_to_vmem [thread:$0]  %s417_s1, 512, %s367_s18, [#allocation7], %s339_s0, %s339_s0, %s340_s11  }
  0x23   :  { %331 = dma.done.wait [#allocation4], 128  }
  0x24   :  { %332 = vsyncadd [#allocation4], 4294967168 }
  0x25   :  { %333 = dma.done.wait [#allocation7], 512  }
  0x26   :  { %334 = vsyncadd [#allocation7], 4294966784  ;;  %v46_v0 = vld [vmem:[#allocation6] sm:$0xff]  ;;  %v45_v3 = vld [vmem:[#allocation3] sm:$0xff] }
  0x27   :  { %v52_v1 = vunpack.c.l.s8.bf16 %v46_v0  ;;  %v53_v2 = vunpack.c.h.s8.bf16 %v46_v0  ;;  %v47_v4 = vld [vmem:[#allocation6 + $0x8] sm:$0xff]  ;;  %v50_v5 = vunpack.c.l.s8.bf16 %v45_v3  ;;  %v48_v8 = vld [vmem:[#allocation6 + $0x10] sm:$0xff]  ;;  %v49_v11 = vld [vmem:[#allocation6 + $0x18] sm:$0xff]  ;;  %v51_v14 = vunpack.c.h.s8.bf16 %v45_v3 }
  0x28   :  { %v54_v6 = vunpack.c.l.s8.bf16 %v47_v4  ;;  %v55_v7 = vunpack.c.h.s8.bf16 %v47_v4  ;;  %v56_v9 = vunpack.c.l.s8.bf16 %v48_v8  ;;  %v57_v10 = vunpack.c.h.s8.bf16 %v48_v8  ;;  %v216_v18 = vld [vmem:[%s418_s2] ss:$0 sm:$0xff]  ;;  %s341_s2 = smov [#allocation8]  }
  0x29   :  { %228 = vmatprep.subr.bf16.mxu0 %v52_v1  ;;  %244 = vmatprep.mubr.bf16.mxu0 %v50_v5  ;;  %v58_v12 = vunpack.c.l.s8.bf16 %v49_v11  ;;  %v59_v13 = vunpack.c.h.s8.bf16 %v49_v11  ;;  %v217_v28 = vld [vmem:[%s419_s3] ss:$0 sm:$0xff]  ;;  %s206_s3 = sshll.u32 %s341_s2, 4  ;;  %s207_s3 = int_to_ptr.vmem [resolvable:$true] %s206_s3 }
  0x2a   :  { %229 = vmatpush3.bf16.msra.mxu0 %v52_v1  ;;  %s309_s17 = scalar_lea.vmem %s207_s3, 128  ;;  %p314_p3 = scmp.lt.s32.totalorder %s207_s3, %s207_s3 }
  0x2b   :  { %230 = vmatprep.subr.bf16.mxu0 %v53_v2  ;;  %p310_p2 = scmp.ne.s32.totalorder %s207_s3, %s309_s17  ;;  %p315_p4 = scmp.lt.s32.totalorder %s309_s17, %s309_s17 }
  0x2d   :  { %p316_p5 = por %p315_p4, %p314_p3 }
  0x2e   :  { %231 = vmatpush3.bf16.msra.mxu0 %v53_v2 }
  0x2f   :  { %232 = vmatprep.subr.bf16.mxu0 %v54_v6  ;;  %p317_p6 = pnand %p316_p5, %p310_p2 }
  0x32   :  { %233 = vmatpush3.bf16.msra.mxu0 %v54_v6 }
  0x33   :  { %234 = vmatprep.subr.bf16.mxu0 %v55_v7 }
  0x36   :  { %235 = vmatpush3.bf16.msra.mxu0 %v55_v7 }
  0x37   :  { %236 = vmatprep.subr.bf16.mxu0 %v56_v9 }
  0x3a   :  { %237 = vmatpush3.bf16.msra.mxu0 %v56_v9 }
  0x3b   :  { %238 = vmatprep.subr.bf16.mxu0 %v57_v10 }
  0x3e   :  { %239 = vmatpush3.bf16.msra.mxu0 %v57_v10 }
  0x3f   :  { %240 = vmatprep.subr.bf16.mxu0 %v58_v12 }
  0x42   :  { %241 = vmatpush3.bf16.msra.mxu0 %v58_v12 }
  0x43   :  { %242 = vmatprep.subr.bf16.mxu0 %v59_v13 }
  0x46   :  { %243 = vmatpush3.bf16.msra.mxu0 %v59_v13 }
  0x49   :  { %245 = vmatmul.mubr.bf16.vlgmr.msra.gmra.mrb[0].mxu0 %v51_v14 }
 0x11c   :  { %v246_v15 = vpop.f32.mrb[0].mxu0 }
 0x11d   :  { %v252_v16 = vtrunc.f32 %v246_v15  ;;  %v95_v17 = vpop.f32.mrb[1].mxu0 }
 0x11e   :  { %v248_v19 = vtrunc.f32 %v95_v17  ;;  %v247_v20 = vpop.f32.mrb[2].mxu0 }
 0x11f   :  { %v253_v21 = vcvt.f32.s32 %v252_v16  ;;  %v254_v22 = vtrunc.f32 %v247_v20  ;;  %v98_v23 = vpop.f32.mrb[3].mxu0 }
 0x120   :  { %v249_v24 = vcvt.f32.s32 %v248_v19  ;;  %v250_v25 = vtrunc.f32 %v98_v23 }
 0x121   :  { %v125_v26 = vadd.s32 %v253_v21, %v216_v18  ;;  %v255_v27 = vcvt.f32.s32 %v254_v22 }
 0x122   :  { %v123_v29 = vadd.s32 %v249_v24, %v216_v18  ;;  %v251_v30 = vcvt.f32.s32 %v250_v25 }
 0x123   :  { %v156_v31 = vcvt.s32.f32 %v125_v26  ;;  %v126_v32 = vadd.s32 %v255_v27, %v216_v18 }
 0x124   :  { %v154_v33 = vcvt.s32.f32 %v123_v29  ;;  %v124_v34 = vadd.s32 %v251_v30, %v216_v18 }
 0x125   :  { %v167_v35 = vmul.f32 %v217_v28, %v156_v31  ;;  %v157_v36 = vcvt.s32.f32 %v126_v32 }
 0x126   :  { %v165_v37 = vmul.f32 %v217_v28, %v154_v33  ;;  %v155_v38 = vcvt.s32.f32 %v124_v34 }
 0x127   :  { %v171_v39 = vadd.f32 3.0, %v167_v35  ;;  %v168_v40 = vmul.f32 %v217_v28, %v157_v36 }
 0x128   :  { %v169_v41 = vadd.f32 3.0, %v165_v37  ;;  %v166_v42 = vmul.f32 %v217_v28, %v155_v38 }
 0x129   :  { %v258_v43 = vround.rtne.f32 %v171_v39  ;;  %v172_v44 = vadd.f32 3.0, %v168_v40 }
 0x12a   :  { %v256_v45 = vround.rtne.f32 %v169_v41  ;;  %v170_v46 = vadd.f32 3.0, %v166_v42 }
 0x12b   :  { %v179_v47 = vmax.f32 %v258_v43, -128.0  ;;  %v259_v48 = vround.rtne.f32 %v172_v44 }
 0x12c   :  { %v177_v49 = vmax.f32 %v256_v45, -128.0  ;;  %v257_v50 = vround.rtne.f32 %v170_v46 }
 0x12d   :  { %v183_v51 = vmin.f32 %v179_v47, 127.0  ;;  %v180_v52 = vmax.f32 %v259_v48, -128.0 }
 0x12e   :  { %v181_v53 = vmin.f32 %v177_v49, 127.0  ;;  %v178_v54 = vmax.f32 %v257_v50, -128.0 }
 0x12f   :  { %v184_v55 = vmin.f32 %v180_v52, 127.0  ;;  %v187_v57 = vtrunc.f32 %v183_v51 }
 0x130   :  { %v182_v56 = vmin.f32 %v178_v54, 127.0  ;;  %v185_v60 = vtrunc.f32 %v181_v53 }
 0x131   :  { %v188_v58 = vtrunc.f32 %v184_v55 }
 0x132   :  { %v186_v59 = vtrunc.f32 %v182_v56 }
 0x133   :  { %v193_v61 = vpack.c.f32.eXmY %v187_v57, %v188_v58, 312 }
 0x134   :  { %v189_v62 = vpack.c.f32.eXmY %v185_v60, %v186_v59, 312 }
 0x136   :  { %v197_v63 = vpack.c.b8 %v193_v61, %v189_v62 }
 0x138   :  { %199 = vst [vmem:[#allocation8] sm:$0xff] %v197_v63 }
 0x139   :  { %320 = shalt.err (!%p317_p6)
}
 0x13a   :  { %s321_s20 = scalar_lea.hbm %s420_s4, 128 }
 0x13b   :  { %p322_p7 = scmp.ne.s32.totalorder %s420_s4, %s321_s20  ;;  %p325_p8 = scmp.lt.u32.totalorder %s321_s20, %s420_s4 }
 0x13d   :  { %p327_p9 = pnand %p325_p8, %p322_p7 }
 0x13f   :  { %330 = shalt.err (!%p327_p9)
}
 0x140   :  { %209 = dma.vmem_to_hbm [thread:$0]  %s207_s3, 128, %s420_s4, [#allocation5]  }
 0x141   :  { %335 = dma.done.wait [#allocation5], 128  }
 0x142   :  { %336 = vsyncadd [#allocation5], 4294967168 }
 0x143   :  { %213 = vsyncpa [#allocation4], 1 }
 0x144   :  { %214 = vsyncpa [#allocation7], 1 }
 0x145   :  { %215 = vsyncpa [#allocation5], 1 }

</bundles_post_ra>
